<compile_context>
chip_gen: v5e
topology: v5e:2x2
jax: 0.10.0
libtpu: 0.0.40
codegen_flags: <defaults>
</compile_context>

<pallas_src>
import jax
import jax.numpy as jnp
from jax.experimental import pallas as pl
from jax.experimental.pallas import tpu as pltpu


INPUT_DIM = 32
HIDDEN_DIM = 64
OUTPUT_DIM = 24

DEFAULT_TB = 1024  # batch tile (lane dim) -- multiple of 128, VMEM-friendly
                   # on all of v5e/v6e/v7x even with double buffering.


def elm_kernel(xT_ref, w1_ref, b1_ref, w2_ref, oT_ref):
    """Fused batch-minor forward:  out.T = W2 @ sigmoid(W1 @ x.T + b1).

    xT_ref : [INPUT_DIM,  TB]          (VMEM)  -- x tile, batch-minor
    w1_ref : [HIDDEN_DIM, INPUT_DIM]   (VMEM)  -- fc1.weight (torch layout)
    b1_ref : [HIDDEN_DIM, 1]           (VMEM)  -- fc1.bias
    w2_ref : [OUTPUT_DIM, HIDDEN_DIM]  (VMEM)  -- fc2.weight (torch layout)
    oT_ref : [OUTPUT_DIM, TB]          (VMEM)  -- output tile, batch-minor
    """
    xT = xT_ref[...]
    # fc1 (MXU matmul, f32 accumulation) + bias broadcast over the lane dim.
    pre = jnp.dot(w1_ref[...], xT, preferred_element_type=jnp.float32)
    pre = pre + b1_ref[...]                      # [H,1] broadcasts over [H,TB]
    # sigmoid activation (EUP exp + VPU), kept in f32.
    h = jax.nn.sigmoid(pre)
    # fc2 (no bias).
    out = jnp.dot(w2_ref[...], h, preferred_element_type=jnp.float32)
    oT_ref[...] = out.astype(oT_ref.dtype)


def _round_up(n, m):
    return (n + m - 1) * 0 + ((n + m - 1) // m) * m


def elm_forward(x, w1, b1, w2, *, tb=DEFAULT_TB):
    """x: [B, INPUT_DIM] f32; w1: [H, I]; b1: [H]; w2: [O, H] (torch shapes).

    Returns [B, OUTPUT_DIM] f32.
    """
    B = x.shape[0]

    # Pick the batch tile: multiple of 128, no larger than needed.
    tile = min(tb, _round_up(max(B, 1), 128))
    b_pad = _round_up(max(B, 1), tile)
    grid = (b_pad // tile,)

    # Pad the batch (tail tile) and flip to batch-minor layout.
    if b_pad != B:
        x = jnp.pad(x, ((0, b_pad - B), (0, 0)))
    xT = x.T                                   # [INPUT_DIM, b_pad]
    b1_2d = b1.reshape(HIDDEN_DIM, 1)

    outT = pl.pallas_call(
        elm_kernel,
        out_shape=jax.ShapeDtypeStruct((OUTPUT_DIM, b_pad), jnp.float32),
        grid=grid,
        in_specs=[
            # Activations: tiled along the (lane-dense) batch axis.
            pl.BlockSpec((INPUT_DIM, tile), lambda i: (0, i)),
            # Weights / bias: full blocks, constant index -> stay VMEM-resident.
            pl.BlockSpec((HIDDEN_DIM, INPUT_DIM), lambda i: (0, 0)),
            pl.BlockSpec((HIDDEN_DIM, 1), lambda i: (0, 0)),
            pl.BlockSpec((OUTPUT_DIM, HIDDEN_DIM), lambda i: (0, 0)),
        ],
        out_specs=pl.BlockSpec((OUTPUT_DIM, tile), lambda i: (0, i)),
        compiler_params=pltpu.CompilerParams(
            # Batch tiles are independent -> shard across both TCs on v7x;
            # harmless no-op on v5e/v6e.
            dimension_semantics=("parallel",),
        ),
    )(xT, w1, b1_2d, w2)

    # Back to [B, OUTPUT_DIM]; drop the padded tail rows.
    return outT[:, :B].T

    # TODO(synk): optional bf16 inputs (f32 accumulation) would halve HBM read
    # traffic for very large B, at the cost of diverging from f32 reference
    # numerics; left out to match the PyTorch module exactly.


def reference_forward(x, w1, b1, w2):
    """Pure-JAX reference matching the PyTorch module semantics."""
    h = jax.nn.sigmoid(x @ w1.T + b1[None, :])
    return h @ w2.T


if __name__ == "__main__":
    key = jax.random.PRNGKey(0)
    k_x, k_w1, k_b1, k_w2 = jax.random.split(key, 4)

    B = 8  # small batch for the self-test

    # torch.nn.Linear-like parameter shapes:
    #   fc1.weight: [hidden, input], fc1.bias: [hidden], fc2.weight: [out, hidden]
    w1 = jax.random.uniform(k_w1, (HIDDEN_DIM, INPUT_DIM), jnp.float32,
                            minval=-1.0 / jnp.sqrt(INPUT_DIM),
                            maxval=1.0 / jnp.sqrt(INPUT_DIM))
    b1 = jax.random.uniform(k_b1, (HIDDEN_DIM,), jnp.float32,
                            minval=-1.0 / jnp.sqrt(INPUT_DIM),
                            maxval=1.0 / jnp.sqrt(INPUT_DIM))
    w2 = jax.random.uniform(k_w2, (OUTPUT_DIM, HIDDEN_DIM), jnp.float32,
                            minval=-1.0 / jnp.sqrt(HIDDEN_DIM),
                            maxval=1.0 / jnp.sqrt(HIDDEN_DIM))

    x = jax.random.normal(k_x, (B, INPUT_DIM), jnp.float32)

    out = elm_forward(x, w1, b1, w2)
    out = jax.block_until_ready(out)

    ref = reference_forward(x, w1, b1, w2)
    assert out.shape == (B, OUTPUT_DIM), out.shape
    assert jnp.allclose(out, ref, atol=1e-5, rtol=1e-5), (
        float(jnp.max(jnp.abs(out - ref))))

    # Also exercise a multi-tile, non-multiple batch to verify tiling/padding.
    B2 = 300
    x2 = jax.random.normal(jax.random.PRNGKey(1), (B2, INPUT_DIM), jnp.float32)
    out2 = jax.block_until_ready(elm_forward(x2, w1, b1, w2, tb=128))
    ref2 = reference_forward(x2, w1, b1, w2)
    assert out2.shape == (B2, OUTPUT_DIM), out2.shape
    assert jnp.allclose(out2, ref2, atol=1e-5, rtol=1e-5), (
        float(jnp.max(jnp.abs(out2 - ref2))))

    print("KERNEL_OK")
</pallas_src>

<mosaic_0001>
module attributes {stable_mosaic.version = 11 : i64} {
  func.func @elm_kernel(%arg0: i32, %arg1: memref<32x128xf32, #tpu.memory_space<vmem>>, %arg2: memref<64x32xf32, #tpu.memory_space<vmem>>, %arg3: memref<64x1xf32, #tpu.memory_space<vmem>>, %arg4: memref<24x64xf32, #tpu.memory_space<vmem>>, %arg5: memref<24x128xf32, #tpu.memory_space<vmem>>) attributes {dimension_semantics = [#tpu.dimension_semantics<parallel>], iteration_bounds = array<i64: 1>, scalar_prefetch = 0 : i64, scratch_operands = 0 : i64, tpu.core_type = #tpu.core_type<tc>, window_params = [{transform_indices = @transform_0, window_bounds = array<i64: 32, 128>}, {pipeline_mode = #tpu.pipeline_mode<synchronous>, transform_indices = @transform_1, window_bounds = array<i64: 64, 32>}, {pipeline_mode = #tpu.pipeline_mode<synchronous>, transform_indices = @transform_2, window_bounds = array<i64: 64, 1>}, {pipeline_mode = #tpu.pipeline_mode<synchronous>, transform_indices = @transform_3, window_bounds = array<i64: 24, 64>}, {transform_indices = @transform_4, window_bounds = array<i64: 24, 128>}]} {
    %c0 = arith.constant 0 : index
    %c0_0 = arith.constant 0 : index
    %0 = vector.load %arg1[%c0, %c0_0] : memref<32x128xf32, #tpu.memory_space<vmem>>, vector<32x128xf32>
    %c0_1 = arith.constant 0 : index
    %c0_2 = arith.constant 0 : index
    %1 = vector.load %arg2[%c0_1, %c0_2] : memref<64x32xf32, #tpu.memory_space<vmem>>, vector<64x32xf32>
    %cst = arith.constant dense<0.000000e+00> : vector<64x128xf32>
    %2 = tpu.matmul %1, %0, %cst {dimension_numbers = #tpu.dot_dimension_numbers<[1], [0], [0], [1], [0, 0, 1, 1], [], []>} : vector<64x32xf32>, vector<32x128xf32>, vector<64x128xf32> -> vector<64x128xf32>
    %c0_3 = arith.constant 0 : index
    %c0_4 = arith.constant 0 : index
    %3 = vector.load %arg3[%c0_3, %c0_4] : memref<64x1xf32, #tpu.memory_space<vmem>>, vector<64x1xf32>
    %4 = vector.broadcast %3 : vector<64x1xf32> to vector<64x128xf32>
    %5 = arith.addf %2, %4 : vector<64x128xf32>
    %6 = arith.negf %5 : vector<64x128xf32>
    %7 = math.exp %6 : vector<64x128xf32>
    %cst_5 = arith.constant 1.000000e+00 : f32
    %8 = vector.broadcast %cst_5 : f32 to vector<64x128xf32>
    %9 = arith.addf %8, %7 : vector<64x128xf32>
    %10 = arith.divf %8, %9 : vector<64x128xf32>
    %c0_6 = arith.constant 0 : index
    %c0_7 = arith.constant 0 : index
    %11 = vector.load %arg4[%c0_6, %c0_7] : memref<24x64xf32, #tpu.memory_space<vmem>>, vector<24x64xf32>
    %cst_8 = arith.constant dense<0.000000e+00> : vector<24x128xf32>
    %12 = tpu.matmul %11, %10, %cst_8 {dimension_numbers = #tpu.dot_dimension_numbers<[1], [0], [0], [1], [0, 0, 1, 1], [], []>} : vector<24x64xf32>, vector<64x128xf32>, vector<24x128xf32> -> vector<24x128xf32>
    %c0_9 = arith.constant 0 : index
    %c0_10 = arith.constant 0 : index
    %13 = vector.load %arg5[%c0_9, %c0_10] : memref<24x128xf32, #tpu.memory_space<vmem>>, vector<24x128xf32>
    tpu.vector_store %arg5[%c0_9, %c0_10], %12 {strides = array<i32>} : memref<24x128xf32, #tpu.memory_space<vmem>>, vector<24x128xf32>,
    return
  }
  func.func @transform_0(%arg0: i32) -> (i32, i32) {
    %c0_i32 = arith.constant 0 : i32
    %c0_i32_0 = arith.constant 0 : i32
    return %c0_i32, %arg0 : i32, i32
  }
  func.func @transform_1(%arg0: i32) -> (i32, i32) {
    %c0_i32 = arith.constant 0 : i32
    %c0_i32_0 = arith.constant 0 : i32
    %c0_i32_1 = arith.constant 0 : i32
    return %c0_i32, %c0_i32_0 : i32, i32
  }
  func.func @transform_2(%arg0: i32) -> (i32, i32) {
    %c0_i32 = arith.constant 0 : i32
    %c0_i32_0 = arith.constant 0 : i32
    %c0_i32_1 = arith.constant 0 : i32
    return %c0_i32, %c0_i32_0 : i32, i32
  }
  func.func @transform_3(%arg0: i32) -> (i32, i32) {
    %c0_i32 = arith.constant 0 : i32
    %c0_i32_0 = arith.constant 0 : i32
    %c0_i32_1 = arith.constant 0 : i32
    return %c0_i32, %c0_i32_0 : i32, i32
  }
  func.func @transform_4(%arg0: i32) -> (i32, i32) {
    %c0_i32 = arith.constant 0 : i32
    %c0_i32_0 = arith.constant 0 : i32
    return %c0_i32, %arg0 : i32, i32
  }
}

</mosaic_0001>

<bundles_post_ra>
// kernel: tpu_custom_call.1
= control target key start
LH: loop header
LB: loop body
LE: loop exit
PB: predicated region body
PF: predicated region fallthrough
CT: control target
= control target key end

     0   :  { %v456_v3 = vmov 0   ;;  %vm78_vm0 = vcmask 261120   ;;  %s730_s0 = inlined_call_operand.vmem [shape: f32[32,128], index: 0, kind: input, shape index: {}]   ;;  %s731_s1 = inlined_call_operand.vmem [shape: f32[64,32], index: 1, kind: input, shape index: {}]   ;;  %s732_s2 = inlined_call_operand.vmem [shape: f32[64,1], index: 2, kind: input, shape index: {}]   ;;  %s733_s3 = inlined_call_operand.vmem [shape: f32[24,64], index: 3, kind: input, shape index: {}]   ;;  %s734_s4 = inlined_call_operand.hbm [shape: f32[24,128], index: 4, kind: output, shape index: {}]  }
   0x1   :  { %v21_v0 = vld [vmem:[%s730_s0 + $0x18] sm:$0xff]  ;;  %v35_v1 = vld [vmem:[%s732_s2 + $0x28] sm:$0xff]  ;;  %v20_v2 = vld [vmem:[%s730_s0 + $0x10] sm:$0xff]  ;;  %396 = vset.pattern.permute.xlu1 %v456_v3  ;;  %395 = vset.pattern.permute.xlu0 %v456_v3 }
   0x2   :  { %115 = vmatpush.msra.mxu0 %v21_v0  ;;  %375 = vmatpush.msra.mxu2 %v21_v0  ;;  %v19_v4 = vld [vmem:[%s730_s0 + $0x8] sm:$0xff]  ;;  %v18_v5 = vld [vmem:[%s730_s0] sm:$0xff]  ;;  %v37_v6 = vld [vmem:[%s732_s2 + $0x38] sm:$0xff] }
   0x3   :  { %376 = vmatpush.msra.mxu3 %v21_v0  ;;  %65 = vperm.xlu1 %396, %v35_v1   ;;  %v22_v7 = vld [vmem:[%s731_s1] sm:$0xff]  ;;  %v25_v8 = vld [vmem:[%s731_s1 + $0x18] sm:$0xff] }
   0x4   :  { %116 = vmatpush.msra.mxu0 %v20_v2  ;;  %377 = vmatpush.msra.mxu2 %v20_v2 }
   0x5   :  { %378 = vmatpush.msra.mxu3 %v20_v2 }
   0x6   :  { %117 = vmatpush.msra.mxu0 %v19_v4  ;;  %379 = vmatpush.msra.mxu2 %v19_v4 }
   0x7   :  { %380 = vmatpush.msra.mxu3 %v19_v4 }
   0x8   :  { %9 = vsyncpa [#allocation3], 0  ;;  %118 = vmatpush.msra.mxu0 %v18_v5  ;;  %v28_v9 = vld [vmem:[%s731_s1 + $0x30] sm:$0xff]  ;;  %75 = vperm.xlu0 %395, %v37_v6   ;;  %v34_v10 = vld [vmem:[%s732_s2 + $0x20] sm:$0xff]  ;;  %s457_s5 = smov [#allocation2]   ;;  %s344_s9 = sshll.u32 %s734_s4, 4  ;;  %s345_s9 = int_to_ptr.hbm [resolvable:$true] %s344_s9 }
   0x9   :  { %381 = vmatpush.msra.mxu2 %v18_v5  ;;  %382 = vmatpush.msra.mxu3 %v18_v5  ;;  %v33_v11 = vld [vmem:[%s732_s2 + $0x18] sm:$0xff]  ;;  %v36_v12 = vld [vmem:[%s732_s2 + $0x30] sm:$0xff]  ;;  %v23_v13 = vld [vmem:[%s731_s1 + $0x8] sm:$0xff]  ;;  %s342_s6 = sshll.u32 %s457_s5, 4  ;;  %s458_s10 = smov 128   ;;  %s343_s6 = int_to_ptr.vmem [resolvable:$true] %s342_s6 }
   0xa   :  { %356 = vmatmul.msk.f32.vlgmr.msra.gmra.mxu0 %vm78_vm0, %v22_v7  ;;  %359 = vmatmul.msk.f32.vlgmr.msra.gmra.mxu2 %vm78_vm0, %v25_v8  ;;  %v26_v14 = vld [vmem:[%s731_s1 + $0x20] sm:$0xff]  ;;  %v29_v15 = vld [vmem:[%s731_s1 + $0x38] sm:$0xff]  ;;  %v32_v17 = vld [vmem:[%s732_s2 + $0x10] sm:$0xff]  ;;  %s459_s11 = smov 8  }
   0xb   :  { %362 = vmatmul.msk.f32.vlgmr.msra.gmra.mxu3 %vm78_vm0, %v28_v9  ;;  %397 = vset.pattern.permute.xlu2 %v456_v3  ;;  %v30_v16 = vld [vmem:[%s732_s2] sm:$0xff]  ;;  %v31_v18 = vld [vmem:[%s732_s2 + $0x8] sm:$0xff]  ;;  %v24_v19 = vld [vmem:[%s731_s1 + $0x10] sm:$0xff] }
   0xc   :  { %60 = vperm.xlu1 %396, %v34_v10   ;;  %55 = vperm.xlu2 %397, %v33_v11   ;;  %v27_v20 = vld [vmem:[%s731_s1 + $0x28] sm:$0xff] }
  0x10   :  { %70 = vperm.xlu0 %395, %v36_v12  }
  0x12   :  { %357 = vmatmul.msk.f32.gmra.mxu0 %vm78_vm0, %v23_v13  ;;  %360 = vmatmul.msk.f32.gmra.mxu2 %vm78_vm0, %v26_v14 }
  0x13   :  { %363 = vmatmul.msk.f32.gmra.mxu3 %vm78_vm0, %v29_v15 }
  0x14   :  { %40 = vperm.xlu1 %396, %v30_v16   ;;  %50 = vperm.xlu2 %397, %v32_v17  }
  0x18   :  { %45 = vperm.xlu0 %395, %v31_v18  }
  0x1a   :  { %358 = vmatmul.msk.f32.gmra.mxu0 %vm78_vm0, %v24_v19  ;;  %361 = vmatmul.msk.f32.gmra.mxu2 %vm78_vm0, %v27_v20 }
  0x66   :  { %v56_v28 = vpop.permute.xlu2 %55 }
  0x6e   :  { %v51_v41 = vpop.permute.xlu2 %50 }
  0x75   :  { %v66_v21 = vpop.permute.xlu1 %65 }
  0x7a   :  { %v76_v22 = vpop.permute.xlu0 %75 }
  0x7e   :  { %v61_v23 = vpop.permute.xlu1 %60 }
  0x82   :  { %v71_v24 = vpop.permute.xlu0 %70 }
  0x86   :  { %v41_v25 = vpop.permute.xlu1 %40 }
  0x87   :  { %v120_v26 = vpop.f32.mrf.mxu0 }
  0x88   :  { %v121_v27 = vadd.f32 %v120_v26, %v41_v25 }
  0x8a   :  { %v364_v30 = vmul.f32 -1.442695, %v121_v27  ;;  %v46_v33 = vpop.permute.xlu0 %45 }
  0x8c   :  { %398 = vpow2.f32 %v364_v30 }
  0x8d   :  { %v129_v29 = vpop.f32.mrf.mxu2 }
  0x8e   :  { %v130_v31 = vadd.f32 %v129_v29, %v56_v28  ;;  %v138_v32 = vpop.f32.mrf.mxu3 }
  0x8f   :  { %v139_v34 = vadd.f32 %v138_v32, %v71_v24  ;;  %v123_v35 = vpop.f32.mrf.mxu0 }
  0x90   :  { %v367_v36 = vmul.f32 -1.442695, %v130_v31  ;;  %v124_v38 = vadd.f32 %v123_v35, %v46_v33 }
  0x91   :  { %v370_v37 = vmul.f32 -1.442695, %v139_v34 }
  0x92   :  { %v365_v39 = vmul.f32 -1.442695, %v124_v38  ;;  %v399_v46 = vpop.eup %398 }
  0x93   :  { %400 = vpow2.f32 %v370_v37  ;;  %v555_v54 = vadd.f32 1.0, %v399_v46 }
  0x94   :  { %402 = vpow2.f32 %v367_v36 }
  0x95   :  { %v132_v40 = vpop.f32.mrf.mxu2  ;;  %404 = vpow2.f32 %v365_v39  ;;  %v185_v17 = vand.u32 2147483647, %v555_v54  ;;  %vm181_vm10 = vweird.f32 %v555_v54 }
  0x96   :  { %v133_v42 = vadd.f32 %v132_v40, %v61_v23  ;;  %v141_v43 = vpop.f32.mrf.mxu3 }
  0x97   :  { %v142_v44 = vadd.f32 %v141_v43, %v76_v22  ;;  %v126_v45 = vpop.f32.mrf.mxu0  ;;  %v187_v22 = vand.u32 2147483648, %v555_v54 }
  0x98   :  { %v368_v47 = vmul.f32 -1.442695, %v133_v42  ;;  %v127_v48 = vadd.f32 %v126_v45, %v51_v41 }
  0x99   :  { %v401_v49 = vpop.eup %400  ;;  %v371_v52 = vmul.f32 -1.442695, %v142_v44 }
  0x9a   :  { %v403_v50 = vpop.eup %402  ;;  %v553_v51 = vadd.f32 1.0, %v401_v49  ;;  %406 = vpow2.f32 %v368_v47  ;;  %v366_v53 = vmul.f32 -1.442695, %v127_v48 }
  0x9b   :  { %v558_v55 = vadd.f32 1.0, %v403_v50  ;;  %v405_v58 = vpop.eup %404 }
  0x9c   :  { %408 = vrcp.f32 %v553_v51  ;;  %v566_v63 = vadd.f32 1.0, %v405_v58  ;;  %v277_v11 = vand.u32 2147483648, %v553_v51  ;;  %v275_v15 = vand.u32 2147483647, %v553_v51 }
  0x9d   :  { %v135_v56 = vpop.f32.mrf.mxu2  ;;  %410 = vpow2.f32 %v371_v52  ;;  %vm271_vm1 = vweird.f32 %v553_v51  ;;  %v232_v26 = vand.u32 2147483648, %v558_v55  ;;  %vm226_vm7 = vweird.f32 %v558_v55 }
  0x9e   :  { %v136_v57 = vadd.f32 %v135_v56, %v66_v21  ;;  %412 = vpow2.f32 %v366_v53  ;;  %v230_v21 = vand.u32 2147483647, %v558_v55  ;;  %v278_v25 = vor.u32 1.1754944e-38, %v277_v11 }
  0x9f   :  { %414 = vrcp.f32 %v555_v54  ;;  %vm606_vm2 = vcmp.eq.f32.partialorder %v275_v15, 8.507059e+37 }
  0xa0   :  { %v407_v59 = vpop.eup %406  ;;  %v369_v60 = vmul.f32 -1.442695, %v136_v57  ;;  %416 = vrcp.f32 %v558_v55 }
  0xa1   :  { %v562_v61 = vadd.f32 1.0, %v407_v59 }
  0xa2   :  { %v564_v62 = vpop.eup %408  ;;  %418 = vpow2.f32 %v369_v60 }
  0xa3   :  { %420 = vrcp.f32 %v562_v61  ;;  %v411_v0 = vpop.eup %410  ;;  %v267_v3 = vmul.f32 %v564_v62, %v553_v51  ;;  %vm272_vm4 = vweird.f32 %v564_v62  ;;  %vm241_vm5 = vweird.f32 %v562_v61 }
  0xa4   :  { %v413_v1 = vpop.eup %412  ;;  %v175_v2 = vadd.f32 1.0, %v411_v0  ;;  %422 = vrcp.f32 %v566_v63  ;;  %vm631_vm12 = vmor %vm271_vm1, %vm272_vm4  ;;  %v245_v58 = vand.u32 2147483647, %v562_v61  ;;  %v247_v59 = vand.u32 2147483648, %v562_v61 }
  0xa5   :  { %v571_v4 = vpop.eup %414  ;;  %v574_v5 = vadd.f32 1.0, %v413_v1  ;;  %v268_v10 = vsub.f32 1.0, %v267_v3 }
  0xa6   :  { %v576_v6 = vpop.eup %416  ;;  %424 = vrcp.f32 %v175_v2  ;;  %v594_v16 = vmul.f32 %v571_v4, %v555_v54  ;;  %v290_v27 = vand.u32 2147483647, %v175_v2  ;;  %v292_v28 = vand.u32 2147483648, %v175_v2  ;;  %v297_v54 = vld [vmem:[%s733_s3 + $0x8] sm:$0xff] }
  0xa7   :  { %426 = vrcp.f32 %v574_v5  ;;  %v222_v13 = vmul.f32 %v576_v6, %v558_v55  ;;  %v269_v19 = vmul.f32 %v564_v62, %v268_v10  ;;  %vm227_vm3 = vweird.f32 %v576_v6 }
  0xa8   :  { %v419_v7 = vpop.eup %418  ;;  %v178_v34 = vsub.f32 1.0, %v594_v16  ;;  %vm286_vm8 = vweird.f32 %v175_v2  ;;  %vm620_vm9 = vcmp.eq.f32.partialorder %v290_v27, 8.507059e+37  ;;  %v293_v42 = vor.u32 1.1754944e-38, %v292_v28 }
  0xa9   :  { %v579_v8 = vpop.eup %420  ;;  %v581_v9 = vadd.f32 1.0, %v419_v7  ;;  %v223_v29 = vsub.f32 1.0, %v222_v13  ;;  %v270_v36 = vadd.f32 %v564_v62, %v269_v19  ;;  %vm182_vm11 = vweird.f32 %v571_v4 }
  0xaa   :  { %v237_v12 = vmul.f32 %v579_v8, %v562_v61  ;;  %v589_v14 = vpop.eup %422  ;;  %vm242_vm13 = vweird.f32 %v579_v8  ;;  %v179_v7 = vmul.f32 %v571_v4, %v178_v34  ;;  %v217_v15 = vand.u32 2147483648, %v574_v5 }
  0xab   :  { %428 = vrcp.f32 %v581_v9  ;;  %v192_v33 = vmul.f32 %v589_v14, %v566_v63  ;;  %v224_v43 = vmul.f32 %v576_v6, %v223_v29  ;;  %v274_v48 = vsel %vm631_vm12, %v564_v62, %v270_v36  ;;  %vm654_vm4 = vmor %vm241_vm5, %vm242_vm13 }
  0xac   :  { %v425_v18 = vpop.eup %424  ;;  %v238_v20 = vsub.f32 1.0, %v237_v12  ;;  %v260_v49 = vand.u32 2147483647, %v581_v9  ;;  %v262_v50 = vand.u32 2147483648, %v581_v9  ;;  %vm197_vm0 = vweird.f32 %v589_v14 }
  0xad   :  { %v600_v23 = vpop.eup %426  ;;  %v282_v24 = vmul.f32 %v425_v18, %v175_v2  ;;  %vm287_vm6 = vweird.f32 %v425_v18  ;;  %v193_v47 = vsub.f32 1.0, %v192_v33  ;;  %vm256_vm1 = vweird.f32 %v581_v9 }
  0xae   :  { %v207_v30 = vmul.f32 %v600_v23, %v574_v5  ;;  %v239_v37 = vmul.f32 %v579_v8, %v238_v20  ;;  %vm288_vm14 = vmor %vm286_vm8, %vm287_vm6  ;;  %v225_v0 = vadd.f32 %v576_v6, %v224_v43  ;;  %v279_v2 = vsel %vm606_vm2, %v278_v25, %v274_v48 }
  0xaf   :  { %v283_v31 = vsub.f32 1.0, %v282_v24  ;;  %v194_v1 = vmul.f32 %v589_v14, %v193_v47  ;;  %vm261_vm8 = vcmp.eq.f32.partialorder %v260_v49, 8.507059e+37  ;;  %v263_v3 = vor.u32 1.1754944e-38, %v262_v50  ;;  %vm672_vm2 = vmor %vm226_vm7, %vm227_vm3 }
  0xb0   :  { %v208_v40 = vsub.f32 1.0, %v207_v30  ;;  %v240_v51 = vadd.f32 %v579_v8, %v239_v37  ;;  %vm212_vm5 = vweird.f32 %v600_v23  ;;  %v248_v12 = vor.u32 1.1754944e-38, %v247_v59 }
  0xb1   :  { %v429_v35 = vpop.eup %428  ;;  %v284_v38 = vmul.f32 %v425_v18, %v283_v31  ;;  %vm211_vm12 = vweird.f32 %v574_v5  ;;  %v215_v16 = vand.u32 2147483647, %v574_v5  ;;  %vm231_vm3 = vcmp.eq.f32.partialorder %v230_v21, 8.507059e+37 }
  0xb2   :  { %v252_v39 = vmul.f32 %v429_v35, %v581_v9  ;;  %vm257_vm15 = vweird.f32 %v429_v35  ;;  %v209_v56 = vmul.f32 %v600_v23, %v208_v40  ;;  %v244_v61 = vsel %vm654_vm4, %v579_v8, %v240_v51  ;;  %vm689_vm7 = vmor %vm211_vm12, %vm212_vm5 }
  0xb3   :  { %v285_v44 = vadd.f32 %v425_v18, %v284_v38  ;;  %vm258_vm6 = vmor %vm256_vm1, %vm257_vm15  ;;  %v229_v8 = vsel %vm672_vm2, %v576_v6, %v225_v0  ;;  %v233_v20 = vor.u32 1.1754944e-38, %v232_v26  ;;  %v202_v6 = vand.u32 2147483648, %v566_v63 }
  0xb4   :  { %v253_v46 = vsub.f32 1.0, %v252_v39  ;;  %v210_v10 = vadd.f32 %v600_v23, %v209_v56  ;;  %vm196_vm13 = vweird.f32 %v566_v63  ;;  %v200_v21 = vand.u32 2147483647, %v566_v63 }
  0xb5   :  { %v289_v52 = vsel %vm288_vm14, %v425_v18, %v285_v44  ;;  %v195_v18 = vadd.f32 %v589_v14, %v194_v1  ;;  %v180_v55 = vadd.f32 %v571_v4, %v179_v7  ;;  %vm704_vm14 = vmor %vm181_vm10, %vm182_vm11  ;;  %v234_v26 = vsel %vm231_vm3, %v233_v20, %v229_v8 }
  0xb6   :  { %v254_v53 = vmul.f32 %v429_v35, %v253_v46  ;;  %v294_v57 = vsel %vm620_vm9, %v293_v42, %v289_v52  ;;  %vm246_vm9 = vcmp.eq.f32.partialorder %v245_v58, 8.507059e+37  ;;  %v214_v5 = vsel %vm689_vm7, %v600_v23, %v210_v10  ;;  %vm198_vm15 = vmor %vm196_vm13, %vm197_vm0 }
  0xb7   :  { %317 = vmatpush.msra.mxu1 %v294_v57  ;;  %383 = vmatpush.msrb.mxu3 %v294_v57  ;;  %v249_v19 = vsel %vm246_vm9, %v248_v12, %v244_v61  ;;  %v218_v27 = vor.u32 1.1754944e-38, %v217_v15  ;;  %vm216_vm1 = vcmp.eq.f32.partialorder %v215_v16, 8.507059e+37  ;;  %v199_v63 = vsel %vm198_vm15, %v589_v14, %v195_v18  ;;  %v296_v14 = vld [vmem:[%s733_s3] sm:$0xff] }
  0xb8   :  { %v255_v60 = vadd.f32 %v429_v35, %v254_v53  ;;  %v203_v28 = vor.u32 1.1754944e-38, %v202_v6  ;;  %v188_v29 = vor.u32 1.1754944e-38, %v187_v22  ;;  %vm201_vm10 = vcmp.eq.f32.partialorder %v200_v21, 8.507059e+37  ;;  %v298_v22 = vld [vmem:[%s733_s3 + $0x10] sm:$0xff] }
  0xb9   :  { %318 = vmatpush.msra.mxu1 %v279_v2  ;;  %384 = vmatpush.msrb.mxu3 %v279_v2  ;;  %v219_v23 = vsel %vm216_vm1, %v218_v27, %v214_v5  ;;  %v184_v30 = vsel %vm704_vm14, %v571_v4, %v180_v55  ;;  %vm186_vm11 = vcmp.eq.f32.partialorder %v185_v17, 8.507059e+37  ;;  %vm299_vm0 = vcmask 523264  }
  0xba   :  { %v259_v9 = vsel %vm258_vm6, %v429_v35, %v255_v60  ;;  %v204_v31 = vsel %vm201_vm10, %v203_v28, %v199_v63  ;;  %v189_v32 = vsel %vm186_vm11, %v188_v29, %v184_v30 }
  0xbb   :  { %v264_v11 = vsel %vm261_vm8, %v263_v3, %v259_v9 }
  0xbc   :  { %319 = vmatpush.msra.mxu1 %v264_v11  ;;  %385 = vmatpush.msrb.mxu3 %v264_v11 }
  0xbe   :  { %320 = vmatpush.msra.mxu1 %v249_v19  ;;  %386 = vmatpush.msrb.mxu3 %v249_v19 }
  0xc0   :  { %321 = vmatpush.msra.mxu1 %v234_v26  ;;  %387 = vmatpush.msrb.mxu3 %v234_v26 }
  0xc2   :  { %322 = vmatpush.msra.mxu1 %v219_v23  ;;  %388 = vmatpush.msrb.mxu3 %v219_v23 }
  0xc4   :  { %323 = vmatpush.msra.mxu1 %v204_v31  ;;  %389 = vmatpush.msrb.mxu3 %v204_v31 }
  0xc6   :  { %324 = vmatpush.msra.mxu1 %v189_v32  ;;  %390 = vmatpush.msrb.mxu3 %v189_v32 }
  0xc7   :  { %372 = vmatmul.msk.f32.vlgmr.msra.gmra.mxu1 %vm299_vm0, %v296_v14  ;;  %374 = vmatmul.msk.f32.vlgmr.msrb.gmra.mxu3 %vm299_vm0, %v298_v22 }
  0xcf   :  { %373 = vmatmul.msk.f32.gmra.mxu1 %vm299_vm0, %v297_v54 }
 0x144   :  { %v326_v4 = vpop.f32.mrf.mxu1 }
 0x145   :  { %335 = vst [vmem:[#allocation2] sm:$0xff] %v326_v4 }
 0x14a   :  { %v332_v17 = vpop.f32.mrf.mxu3 }
 0x14b   :  { %337 = vst [vmem:[#allocation2 + $0x10] sm:$0xff] %v332_v17 }
 0x14c   :  { %v329_v33 = vpop.f32.mrf.mxu1 }
 0x14d   :  { %336 = vst [vmem:[#allocation2 + $0x8] sm:$0xff] %v329_v33 }
 0x14e   :  { %350 = dma.vmem_to_hbm [thread:$0]  %s343_s6, 384, %s345_s9, [#allocation3], %s458_s10, %s458_s10, %s459_s11  }
 0x14f   :  { %454 = dma.done.wait [#allocation3], 384  }
 0x150   :  { %455 = vsyncadd [#allocation3], 4294966912 }
 0x151   :  { %355 = vsyncpa [#allocation3], 1 }

</bundles_post_ra>
